<compile_context>
chip_gen: v5e
topology: v5e:2x2
jax: 0.10.0
libtpu: 0.0.40
codegen_flags: <defaults>
</compile_context>

<pallas_src>
import functools

import jax
import jax.numpy as jnp
import numpy as np
from jax import lax
from jax.experimental import pallas as pl
from jax.experimental.pallas import tpu as pltpu


def _round_down(a, b):
    return a // b * b


def _vmem_limit_bytes():
    """Generation-aware scoped-VMEM request for the pallas_calls."""
    try:
        cap = int(pltpu.get_tpu_info().vmem_capacity_bytes)
    except Exception:  # conservative fallback if the query is unavailable
        cap = 64 * 1024 * 1024
    if cap >= 128 * 1024 * 1024:          # v5e / v6e: 128 MiB physical VMEM
        return 64 * 1024 * 1024
    return 40 * 1024 * 1024               # v7x: 64 MiB physical per TensorCore


# ------------------------------ L_id kernel --------------------------------
def _lid_kernel(x_ref, y_ref, out_ref, *, n_valid):
    i = pl.program_id(0)
    x = x_ref[...]                               # [TN, C] native dtype (no f32 copy)
    y = y_ref[...]                               # [TN, 1] int32 labels
    tn, c = x.shape

    # logsumexp: max / subtract in the native dtype, exp & accumulate in f32.
    # Exactly one exp per element.
    m = jnp.max(x, axis=1, keepdims=True)                               # [TN,1]
    ex = jnp.exp((x - m).astype(jnp.float32))                           # [TN,C] f32
    lse = jnp.log(jnp.sum(ex, axis=1, keepdims=True)) + m.astype(jnp.float32)

    # Target logit x[r, y[r]] via one-hot select (native dtype, then f32).
    # NOTE: out-of-range labels silently give tgt = 0 (torch would raise).
    cols = lax.broadcasted_iota(jnp.int32, (tn, c), 1)
    tgt = jnp.sum(jnp.where(cols == y, x, jnp.zeros_like(x)),
                  axis=1, keepdims=True).astype(jnp.float32)            # [TN,1]

    # Mask rows of the ragged last block; reads there are garbage, the
    # jnp.where drops any NaN/Inf they produce.  Mask applied to final value.
    rows = lax.broadcasted_iota(jnp.int32, (tn, 1), 0) + i * tn
    per_row = jnp.where(rows < n_valid, lse - tgt, 0.0)                 # [TN,1]

    # One partial sum per tile, replicated over the 8 sublanes of the output
    # block (the wrapper divides by 8*N).
    out_ref[...] = jnp.full(out_ref.shape, jnp.sum(per_row), dtype=jnp.float32)


# ------------------------------ L_fd kernel --------------------------------
def _lfd_kernel(ff_ref, lfd_ref, *, tau2):
    f = ff_ref[...]                              # [D, B] native dtype / layout

    # Per-feature inverse norms, computed once in f32, with 1/tau2 folded in:
    #   r_j = 1 / (||ff_j|| * sqrt(tau2))        (rsqrt(0) -> inf, same as ref)
    f32 = f.astype(jnp.float32)
    r = lax.rsqrt(jnp.sum(f32 * f32, axis=0, keepdims=True) * tau2)     # [1, B]

    # Normalize features in the native dtype (bf16 inputs keep the MXU on its
    # native bf16 path), then Gram with dim-0/dim-0 contraction:
    #   coef = (norm_ff.T @ norm_ff) / tau2      (no HBM-level transpose of ff)
    fn = f * r.astype(f.dtype)                                          # [D, B]
    coef = lax.dot_general(fn, fn, (((0,), (0,)), ((), ())),
                           preferred_element_type=jnp.float32)          # [B, B]
    b = coef.shape[0]

    m = jnp.max(coef, axis=1, keepdims=True)
    lse = jnp.log(jnp.sum(jnp.exp(coef - m), axis=1, keepdims=True)) + m  # [B,1]

    # Numeric diagonal as the target logits (robust to the matmul dtype --
    # with bf16 features it drifts slightly from the analytic 1/tau2).
    rid = lax.broadcasted_iota(jnp.int32, (b, b), 0)
    cid = lax.broadcasted_iota(jnp.int32, (b, b), 1)
    diag = jnp.sum(jnp.where(rid == cid, coef, 0.0), axis=1, keepdims=True)

    lfd_ref[...] = jnp.mean(lse - diag, keepdims=True)                  # (1,1)


# ------------------------------- wrapper ------------------------------------
def loss_pallas(x, ff, y, tau2):
    """x: [N, C] logits, ff: [D, B] features, y: [N] int labels."""
    N, C = x.shape
    D, B = ff.shape
    x_itemsize = int(jnp.dtype(x.dtype).itemsize)
    ff_itemsize = int(jnp.dtype(ff.dtype).itemsize)

    vmem_limit = _vmem_limit_bytes()

    # ----- L_id: tiled, pipelined, megacore-parallel scan over the batch ----
    # Row tile sized so that (double-buffered input) + (~12 B/elt of in-kernel
    # f32/int32 temporaries: exp result, column iota, intermediates) fit well
    # inside the scoped VMEM limit.  Rows rounded to the dtype packing
    # multiple (8 for f32, 16 for bf16, 32 for int8/fp8).
    row_align = max(8, 32 // x_itemsize)
    per_row_bytes = max(1, C) * (2 * x_itemsize + 12)
    usable = int(vmem_limit * 0.75)
    rows_fit = max(row_align, _round_down(usable // per_row_bytes, row_align))
    tn = N if N <= rows_fit else rows_fit      # single full block, or aligned tiles
    num_tiles = (N + tn - 1) // tn             # ragged last block handled in-kernel

    y2 = y.astype(jnp.int32).reshape(N, 1)

    partial = pl.pallas_call(
        functools.partial(_lid_kernel, n_valid=N),
        out_shape=jax.ShapeDtypeStruct((num_tiles * 8, 1), jnp.float32),
        grid=(num_tiles,),
        in_specs=[
            pl.BlockSpec((tn, C), lambda i: (i, 0)),
            pl.BlockSpec((tn, 1), lambda i: (i, 0)),
        ],
        out_specs=pl.BlockSpec((8, 1), lambda i: (i, 0)),
        compiler_params=pltpu.CompilerParams(
            dimension_semantics=("parallel",),
            vmem_limit_bytes=vmem_limit,
        ),
        cost_estimate=pl.CostEstimate(
            flops=6 * N * C,
            transcendentals=N * C + N,
            bytes_accessed=N * C * x_itemsize + 8 * N,
        ),
    )(x, y2)
    l_id = jnp.sum(partial) / np.float32(8 * N)   # 8 = sublane replication factor

    # ----- L_fd: single small call (Gram on MXU + softmax CE) ---------------
    # TODO(synk): for large B / D, tile the Gram over D with an "arbitrary"
    # grid axis + f32 VMEM accumulator (and flash-style blocking over B) so
    # the [B, B] softmax never has to be VMEM-resident in one piece.
    l_fd = pl.pallas_call(
        functools.partial(_lfd_kernel, tau2=float(tau2)),
        out_shape=jax.ShapeDtypeStruct((1, 1), jnp.float32),
        in_specs=[pl.BlockSpec((D, B), lambda: (0, 0))],
        out_specs=pl.BlockSpec((1, 1), lambda: (0, 0)),
        compiler_params=pltpu.CompilerParams(
            vmem_limit_bytes=vmem_limit,
        ),
        cost_estimate=pl.CostEstimate(
            flops=2 * B * B * D + 2 * B * D + 8 * B * B,
            transcendentals=B * B + 3 * B,
            bytes_accessed=D * B * ff_itemsize + 4,
        ),
    )(ff)[0, 0]

    return l_id, l_fd


def loss_reference(x, ff, y, tau2):
    """Pure-JAX reference matching the torch semantics."""
    lse = jax.nn.logsumexp(x, axis=1)
    tgt = jnp.take_along_axis(x, y[:, None], axis=1)[:, 0]
    l_id = jnp.mean(lse - tgt)

    norm_ff = ff / jnp.sqrt(jnp.sum(ff ** 2, axis=0, keepdims=True))
    coef = (norm_ff.T @ norm_ff) / tau2
    lse2 = jax.nn.logsumexp(coef, axis=1)
    diag = jnp.diagonal(coef)
    l_fd = jnp.mean(lse2 - diag)
    return l_id, l_fd


if __name__ == "__main__":
    tau2 = 0.5
    N, C = 8, 16      # batch, num classes
    D, B = 32, 8      # feature dim, batch (ff is [D, B] as in torch.mm(ff.t(), ff))

    key = jax.random.PRNGKey(0)
    kx, kf, ky = jax.random.split(key, 3)
    x = jax.random.normal(kx, (N, C), dtype=jnp.float32)
    ff = jax.random.normal(kf, (D, B), dtype=jnp.float32)
    y = jax.random.randint(ky, (N,), 0, C, dtype=jnp.int32)

    l_id, l_fd = loss_pallas(x, ff, y, tau2)
    jax.block_until_ready((l_id, l_fd))

    r_id, r_fd = loss_reference(x, ff, y, tau2)
    assert np.allclose(np.asarray(l_id), np.asarray(r_id), rtol=1e-5, atol=1e-5)
    assert np.allclose(np.asarray(l_fd), np.asarray(r_fd), rtol=1e-5, atol=1e-5)

    print("KERNEL_OK")
</pallas_src>

<mosaic_0001>
module attributes {stable_mosaic.version = 11 : i64} {
  func.func @_lid_kernel(%arg0: i32, %arg1: memref<8x16xf32, #tpu.memory_space<vmem>>, %arg2: memref<8x1xi32, #tpu.memory_space<vmem>>, %arg3: memref<8x1xf32, #tpu.memory_space<vmem>>) attributes {dimension_semantics = [#tpu.dimension_semantics<parallel>], iteration_bounds = array<i64: 1>, scalar_prefetch = 0 : i64, scratch_operands = 0 : i64, tpu.core_type = #tpu.core_type<tc>, window_params = [{transform_indices = @transform_0, window_bounds = array<i64: 8, 16>}, {transform_indices = @transform_1, window_bounds = array<i64: 8, 1>}, {transform_indices = @transform_2, window_bounds = array<i64: 8, 1>}]} {
    %c0 = arith.constant 0 : index
    %c0_0 = arith.constant 0 : index
    %0 = vector.load %arg1[%c0, %c0_0] : memref<8x16xf32, #tpu.memory_space<vmem>>, vector<8x16xf32>
    %c0_1 = arith.constant 0 : index
    %c0_2 = arith.constant 0 : index
    %1 = vector.load %arg2[%c0_1, %c0_2] : memref<8x1xi32, #tpu.memory_space<vmem>>, vector<8x1xi32>
    %cst = arith.constant dense<0xFF800000> : vector<8xf32>
    %2 = vector.multi_reduction <maximumf>, %0, %cst [1] : vector<8x16xf32> to vector<8xf32>
    %3 = vector.shape_cast %2 : vector<8xf32> to vector<8x1xf32>
    %4 = vector.broadcast %3 : vector<8x1xf32> to vector<8x16xf32>
    %5 = arith.subf %0, %4 : vector<8x16xf32>
    %6 = math.exp %5 : vector<8x16xf32>
    %cst_3 = arith.constant dense<0.000000e+00> : vector<8xf32>
    %7 = vector.multi_reduction <add>, %6, %cst_3 [1] : vector<8x16xf32> to vector<8xf32>
    %8 = vector.shape_cast %7 : vector<8xf32> to vector<8x1xf32>
    %9 = math.log %8 : vector<8x1xf32>
    %10 = arith.addf %9, %3 : vector<8x1xf32>
    %11 = tpu.iota {dimensions = array<i32: 1>} : vector<8x16xi32>
    %12 = vector.broadcast %1 : vector<8x1xi32> to vector<8x16xi32>
    %13 = arith.cmpi eq, %11, %12 : vector<8x16xi32>
    %cst_4 = arith.constant 0.000000e+00 : f32
    %14 = vector.broadcast %cst_4 : f32 to vector<8x16xf32>
    %15 = arith.select %13, %0, %14 : vector<8x16xi1>, vector<8x16xf32>
    %cst_5 = arith.constant dense<0.000000e+00> : vector<8xf32>
    %16 = vector.multi_reduction <add>, %15, %cst_5 [1] : vector<8x16xf32> to vector<8xf32>
    %17 = vector.shape_cast %16 : vector<8xf32> to vector<8x1xf32>
    %18 = tpu.iota {dimensions = array<i32: 0>} : vector<8x1xi32>
    %c8_i32 = arith.constant 8 : i32
    %19 = arith.muli %arg0, %c8_i32 : i32
    %20 = vector.broadcast %19 : i32 to vector<8x1xi32>
    %21 = arith.addi %18, %20 : vector<8x1xi32>
    %c8_i32_6 = arith.constant 8 : i32
    %22 = vector.broadcast %c8_i32_6 : i32 to vector<8x1xi32>
    %23 = arith.cmpi slt, %21, %22 : vector<8x1xi32>
    %24 = arith.subf %10, %17 : vector<8x1xf32>
    %cst_7 = arith.constant 0.000000e+00 : f32
    %25 = vector.broadcast %cst_7 : f32 to vector<8x1xf32>
    %26 = arith.select %23, %24, %25 : vector<8x1xi1>, vector<8x1xf32>
    %27 = vector.shape_cast %26 : vector<8x1xf32> to vector<1x8x1xf32>
    %cst_8 = arith.constant dense<0.000000e+00> : vector<1xf32>
    %28 = vector.multi_reduction <add>, %27, %cst_8 [1, 2] : vector<1x8x1xf32> to vector<1xf32>
    %29 = vector.shape_cast %28 : vector<1xf32> to vector<1x1x1xf32>
    %30 = vector.extract %29[0, 0, 0] : f32 from vector<1x1x1xf32>
    %31 = vector.broadcast %30 : f32 to vector<8x1xf32>
    %c0_9 = arith.constant 0 : index
    %c0_10 = arith.constant 0 : index
    %32 = vector.load %arg3[%c0_9, %c0_10] : memref<8x1xf32, #tpu.memory_space<vmem>>, vector<8x1xf32>
    tpu.vector_store %arg3[%c0_9, %c0_10], %31 {strides = array<i32>} : memref<8x1xf32, #tpu.memory_space<vmem>>, vector<8x1xf32>,
    return
  }
  func.func @transform_0(%arg0: i32) -> (i32, i32) {
    %c0_i32 = arith.constant 0 : i32
    %c0_i32_0 = arith.constant 0 : i32
    return %arg0, %c0_i32 : i32, i32
  }
  func.func @transform_1(%arg0: i32) -> (i32, i32) {
    %c0_i32 = arith.constant 0 : i32
    %c0_i32_0 = arith.constant 0 : i32
    return %arg0, %c0_i32 : i32, i32
  }
  func.func @transform_2(%arg0: i32) -> (i32, i32) {
    %c0_i32 = arith.constant 0 : i32
    %c0_i32_0 = arith.constant 0 : i32
    return %arg0, %c0_i32 : i32, i32
  }
}

</mosaic_0001>

<bundles_post_ra>
// kernel: tpu_custom_call.1
= control target key start
LH: loop header
LB: loop body
LE: loop exit
PB: predicated region body
PF: predicated region fallthrough
CT: control target
= control target key end

     0   :  { %vm13_vm0 = vcmask 130048   ;;  %v69_v1 = vmov 0   ;;  %v26_v9 = vlaneseq  ;;  %vm44_vm2 = vcmask 7168   ;;  %s97_s0 = inlined_call_operand.vmem [shape: f32[8,16], index: 0, kind: input, shape index: {}]   ;;  %s98_s1 = inlined_call_operand.vmem [shape: s32[8,1], index: 1, kind: input, shape index: {}]   ;;  %s99_s2 = inlined_call_operand.vmem [shape: f32[8,1], index: 2, kind: output, shape index: {}]  }
   0x1   :  { %v11_v0 = vld [vmem:[%s97_s0] sm:$0xff]  ;;  %64 = vset.pattern.permute.xlu0 %v69_v1 }
   0x2   :  { %v14_v2 = vsel %vm13_vm0, %v11_v0, -inf  ;;  %v12_v3 = vld [vmem:[%s98_s1] sm:$0xff]  ;;  %v27_v10 = vand.u32 127, %v26_v9 }
   0x3   :  { %15 = vmax.xlane.f32.xlu0 %v14_v2 }
  0x17   :  { %29 = vperm.xlu0 %64, %v12_v3  }
  0x76   :  { %v16_v4 = vpop.xlane.xlu0 %15 }
  0x77   :  { %v17_v5 = vsub.f32 %v11_v0, %v16_v4 }
  0x79   :  { %v18_v6 = vmul.f32 1.442695, %v17_v5 }
  0x7b   :  { %65 = vpow2.f32 %v18_v6 }
  0x81   :  { %v66_v7 = vpop.eup %65 }
  0x82   :  { %v20_v8 = vsel %vm13_vm0, %v66_v7, 0.0 }
  0x83   :  { %21 = vadd.xlane.f32.xlu1 %v20_v8 }
  0x89   :  { %v30_v11 = vpop.permute.xlu0 %29 }
  0x8a   :  { %vm31_vm1 = vcmp.eq.s32.totalorder %v27_v10, %v30_v11 }
  0x8b   :  { %v32_v12 = vsel %vm31_vm1, %v11_v0, 0.0 }
  0x8c   :  { %v33_v13 = vsel %vm13_vm0, %v32_v12, 0.0 }
  0x8d   :  { %34 = vadd.xlane.f32.xlu1 %v33_v13 }
  0xf6   :  { %v22_v14 = vpop.xlane.xlu1 %21 }
  0xf7   :  { %67 = vlog2.f32 %v22_v14 }
  0xfd   :  { %v68_v15 = vpop.eup %67 }
  0xfe   :  { %v24_v16 = vmul.f32 0.6931472, %v68_v15 }
 0x100   :  { %v25_v17 = vadd.f32 %v24_v16, %v16_v4  ;;  %v35_v18 = vpop.xlane.xlu1 %34 }
 0x102   :  { %v42_v19 = vsub.f32 %v25_v17, %v35_v18 }
 0x104   :  { %v45_v20 = vsel %vm44_vm2, %v42_v19, 0.0 }
 0x105   :  { %46 = vadd.xlane.f32.xlu2 %v45_v20 }
 0x178   :  { %v47_v21 = vpop.xlane.xlu2 %46 }
 0x179   :  { %v48_v22 = vrot.slane %v47_v21, 4 }
 0x17b   :  { %v49_v23 = vadd.f32 %v48_v22, %v47_v21 }
 0x17d   :  { %v50_v24 = vrot.slane %v49_v23, 2 }
 0x17f   :  { %v51_v25 = vadd.f32 %v50_v24, %v49_v23 }
 0x181   :  { %v52_v26 = vrot.slane %v51_v25, 1 }
 0x183   :  { %v53_v27 = vadd.f32 %v52_v26, %v51_v25 }
 0x185   :  { %61 = vpush %v53_v27 }
 0x1b6   :  { %s62_s0 = spop %61 }
 0x1b7   :  { %v55_v28 = vstv %s62_s0 }
 0x1b8   :  { %56 = vst.msk [vmem:[%s99_s2] sm:$0xff] %vm44_vm2, %v55_v28 }

</bundles_post_ra>
